<compile_context>
chip_gen: v6e
topology: v6e:2x2x1
jax: 0.10.0
libtpu: 0.0.40
codegen_flags: <defaults>
</compile_context>

<pallas_src>
import jax
import jax.numpy as jnp
from jax.experimental import pallas as pl
from jax.experimental.pallas import tpu as pltpu

_MIB = 2 ** 20


# ----------------------------------------------------------------------------
# Per-generation VMEM sizing: v5e/v6e have 128 MiB VMEM, v7x has 64 MiB.
# ----------------------------------------------------------------------------
def _vmem_sizing():
    cap = 64 * _MIB
    try:
        info = pltpu.get_tpu_info()
        cap = int(getattr(info, "vmem_capacity_bytes", cap))
    except Exception:
        pass
    if cap >= 100 * _MIB:           # v5e / v6e class (128 MiB physical VMEM)
        return 48 * _MIB, 96 * _MIB  # (tile budget, vmem_limit cap)
    return 20 * _MIB, 48 * _MIB      # v7x class (64 MiB physical VMEM)


# ----------------------------------------------------------------------------
# One-time, eager capability probe for pl.Buffered(3) (Mosaic compile errors
# are raised here, outside any user jit, so a failure degrades gracefully to
# default double-buffering instead of being silently swallowed).
# ----------------------------------------------------------------------------
_BUFFERED3_OK = None


def _buffered3_supported():
    global _BUFFERED3_OK
    if _BUFFERED3_OK is not None:
        return _BUFFERED3_OK
    try:
        def _probe_kernel(x_ref, o_ref):
            o_ref[...] = x_ref[...] + 1.0

        fn = pl.pallas_call(
            _probe_kernel,
            out_shape=jax.ShapeDtypeStruct((32, 128), jnp.float32),
            grid=(4,),
            in_specs=[pl.BlockSpec((8, 128), lambda i: (i, 0),
                                   pipeline_mode=pl.Buffered(3))],
            out_specs=pl.BlockSpec((8, 128), lambda i: (i, 0)),
        )
        jax.jit(fn).lower(jnp.zeros((32, 128), jnp.float32)).compile()
        _BUFFERED3_OK = True
    except Exception:
        _BUFFERED3_OK = False
    return _BUFFERED3_OK


# ----------------------------------------------------------------------------
# Node-dim (lane) tile width.
# ----------------------------------------------------------------------------
def _choose_tn(n_nodes, ch, c_out, out_bytes, a_bytes, budget):
    """Small/medium N: one full-width tile (block dim == full array dim is
    legal and lane-dense).  Large N: largest multiple of 128 whose streaming
    buffers fit the per-generation VMEM budget; the grid uses cdiv (short last
    tile) instead of requiring divisibility, so we never silently drop to 128.
    """
    def est(tn, nbuf):
        return (nbuf * n_nodes * tn * 4          # graph tiles (f32 in HBM)
                + nbuf * ch * tn * 4             # h tiles (f32 in HBM)
                + 2 * c_out * tn * out_bytes     # output tiles
                + 2 * c_out * n_nodes * a_bytes)  # per-batch pre-reduction

    if est(n_nodes, 2) <= budget:
        return n_nodes
    cands = [t for t in (2048, 1792, 1536, 1280, 1024, 896, 768, 640,
                         512, 384, 256, 128) if t < n_nodes]
    fitting = [t for t in cands if est(t, 3) <= budget]
    if not fitting:
        return 128
    best = fitting[0]
    divisors = [t for t in fitting if n_nodes % t == 0 and 2 * t >= best]
    return divisors[0] if divisors else best


# ----------------------------------------------------------------------------
# Kernel
# ----------------------------------------------------------------------------
def _make_mpnn_kernel(concat_h, mxu_dtype):
    exact = jnp.dtype(mxu_dtype) == jnp.dtype(jnp.float32)
    prec = jax.lax.Precision.HIGHEST if exact else None

    def _finish(a_ref, g_ref, o_ref, extra):
        # Graph stays f32 in HBM (no wrapper pad/concat/cast pass); cast to
        # the MXU dtype right before the dot.  f32 accumulation.
        g = g_ref[0].astype(mxu_dtype)
        acc = jnp.dot(a_ref[0], g, preferred_element_type=jnp.float32,
                      precision=prec)
        o_ref[0] = (acc + extra).astype(o_ref.dtype)

    if concat_h:
        def kernel(a_ref, g_ref, h_ref, wh_ref, b_ref, o_ref):
            hc = jnp.dot(wh_ref[...], h_ref[0].astype(mxu_dtype),
                         preferred_element_type=jnp.float32, precision=prec)
            _finish(a_ref, g_ref, o_ref, hc + b_ref[...])
        return kernel

    def kernel(a_ref, g_ref, b_ref, o_ref):
        _finish(a_ref, g_ref, o_ref, b_ref[...])
    return kernel


# ----------------------------------------------------------------------------
# Parameter preparation (Conv1d k=1 weight split, hoisted out of forward).
# ----------------------------------------------------------------------------
def prepare_mpnn_params(weight, bias, c, n, ch, *, concat_h=True):
    """weight: (C_OUT, C*N + CH) if concat_h else (C_OUT, C*N); bias: (C_OUT,)."""
    c_out = weight.shape[0]
    # wm3[c, o, m] = weight[o, c*N + m]
    wm3 = weight[:, :c * n].reshape(c_out, c, n).transpose(1, 0, 2)   # (C, C_OUT, N)
    wh = weight[:, c * n:] if concat_h else None                      # (C_OUT, CH)
    bias2 = bias.reshape(c_out, 1).astype(jnp.float32)
    return dict(wm3=wm3, wh=wh, bias=bias2, c=c, n=n, ch=ch,
                c_out=c_out, concat_h=concat_h)


# ----------------------------------------------------------------------------
# Forward
# ----------------------------------------------------------------------------
def mpnn_forward(params, x, h, graph, *, mxu_dtype=jnp.bfloat16):
    b, c, n = x.shape
    assert c == params["c"] and n == params["n"]
    concat_h = params["concat_h"]
    c_out, ch = params["c_out"], params["ch"]
    out_dtype = x.dtype
    out_bytes = jnp.dtype(out_dtype).itemsize
    a_bytes = jnp.dtype(mxu_dtype).itemsize

    # Channel pre-reduction hoisted out of the kernel:
    #   a_all[b, o, m] = sum_c weight[o, c*N + m] * x[b, c, m]   (tiny: B x C_OUT x N)
    a_all = jnp.einsum("con,bcn->bon", params["wm3"], x,
                       precision=jax.lax.Precision.HIGHEST).astype(mxu_dtype)

    budget, vmem_cap = _vmem_sizing()
    tn = _choose_tn(n, ch if concat_h else 0, c_out, out_bytes, a_bytes, budget)
    n_tiles = pl.cdiv(n, tn)

    use_buf3 = (n_tiles >= 2) and _buffered3_supported()
    nbuf_g = 3 if use_buf3 else 2

    def stream_spec(shape, idx):
        if use_buf3:
            return pl.BlockSpec(shape, idx, pipeline_mode=pl.Buffered(3))
        return pl.BlockSpec(shape, idx)

    in_specs = [
        pl.BlockSpec((1, c_out, n), lambda i, j: (i, 0, 0)),    # a_all (per batch)
        stream_spec((1, n, tn), lambda i, j: (i, 0, j)),        # graph tile (f32)
    ]
    operands = [a_all, graph]
    if concat_h:
        in_specs.append(stream_spec((1, ch, tn), lambda i, j: (i, 0, j)))  # h tile
        in_specs.append(pl.BlockSpec((c_out, ch), lambda i, j: (0, 0)))    # wh
        operands += [h, params["wh"].astype(mxu_dtype)]
    in_specs.append(pl.BlockSpec((c_out, 1), lambda i, j: (0, 0)))         # bias
    operands.append(params["bias"])

    g_bytes = jnp.dtype(graph.dtype).itemsize
    h_bytes = jnp.dtype(h.dtype).itemsize if concat_h else 0
    est = (nbuf_g * n * tn * g_bytes
           + (nbuf_g * ch * tn * h_bytes if concat_h else 0)
           + 2 * c_out * tn * out_bytes
           + 2 * c_out * n * a_bytes
           + (2 * c_out * ch * a_bytes if concat_h else 0)
           + 2 * c_out * 4)
    vmem_limit = int(min(max(2 * est, 32 * _MIB), vmem_cap))

    flops = 2 * b * c_out * n * n + (2 * b * c_out * ch * n if concat_h else 0)
    bytes_accessed = (graph.size * g_bytes
                      + (h.size * h_bytes if concat_h else 0)
                      + a_all.size * a_bytes
                      + b * c_out * n * out_bytes
                      + c_out * ((ch * a_bytes + 4) if concat_h else 4))

    return pl.pallas_call(
        _make_mpnn_kernel(concat_h, mxu_dtype),
        out_shape=jax.ShapeDtypeStruct((b, c_out, n), out_dtype),
        grid_spec=pltpu.PrefetchScalarGridSpec(
            num_scalar_prefetch=0,
            grid=(b, n_tiles),
            in_specs=in_specs,
            out_specs=pl.BlockSpec((1, c_out, tn), lambda i, j: (i, 0, j)),
        ),
        compiler_params=pltpu.CompilerParams(
            # No scratch-carried state -> both axes "parallel" (lets v7x shard
            # batch AND node tiles across its two TensorCores).
            dimension_semantics=("parallel", "parallel"),
            vmem_limit_bytes=vmem_limit,
        ),
        cost_estimate=pl.CostEstimate(flops=int(flops), transcendentals=0,
                                      bytes_accessed=int(bytes_accessed)),
    )(*operands)


# ----------------------------------------------------------------------------
# Pure-JAX oracle (transcription of the PyTorch forward)
# ----------------------------------------------------------------------------
def mpnn_reference(x, h, graph, weight, bias, *, concat_h=True):
    b, c, n = x.shape
    msg = (x[:, :, :, None] * graph[:, None, :, :]).reshape(b, c * n, n)
    inp = jnp.concatenate([msg, h], axis=1) if concat_h else msg
    out = jnp.einsum("oi,bin->bon", weight, inp,
                     precision=jax.lax.Precision.HIGHEST)
    return out + bias[None, :, None]


if __name__ == "__main__":
    key = jax.random.PRNGKey(0)
    B, C, N, CH, C_OUT = 2, 4, 16, 8, 16
    k1, k2, k3, k4, k5 = jax.random.split(key, 5)

    x = jax.random.normal(k1, (B, C, N), jnp.float32)
    h = jax.random.normal(k2, (B, CH, N), jnp.float32)
    graph = jax.random.normal(k3, (B, N, N), jnp.float32)

    # Conv1d(c_in = C*N + CH, c_out = C_OUT, kernel_size=1) parameters.
    c_in = C * N + CH
    weight = jax.random.normal(k4, (C_OUT, c_in), jnp.float32) * 0.1
    bias = jax.random.normal(k5, (C_OUT,), jnp.float32) * 0.1

    params = prepare_mpnn_params(weight, bias, C, N, CH, concat_h=True)
    ref = mpnn_reference(x, h, graph, weight, bias, concat_h=True)

    # Exact-algebra check (f32 MXU operands, highest precision).
    out_f32 = jax.block_until_ready(
        mpnn_forward(params, x, h, graph, mxu_dtype=jnp.float32))
    assert out_f32.shape == (B, C_OUT, N)
    assert jnp.allclose(out_f32, ref, atol=1e-4, rtol=1e-4), "f32 mismatch"

    # Default fast path: bf16 MXU operands, f32 accumulation.
    out_bf16 = jax.block_until_ready(mpnn_forward(params, x, h, graph))
    assert out_bf16.shape == (B, C_OUT, N)
    assert jnp.allclose(out_bf16, ref, atol=3e-2, rtol=3e-2), "bf16 mismatch"

    # concat_h=False variant (no h / wh operands at all).
    weight_nh = weight[:, : C * N]
    params_nh = prepare_mpnn_params(weight_nh, bias, C, N, CH, concat_h=False)
    out_nh = jax.block_until_ready(mpnn_forward(params_nh, x, h, graph))
    ref_nh = mpnn_reference(x, h, graph, weight_nh, bias, concat_h=False)
    assert jnp.allclose(out_nh, ref_nh, atol=3e-2, rtol=3e-2), "concat_h=False mismatch"

    print("KERNEL_OK")
</pallas_src>

<mosaic_0001>
module attributes {stable_mosaic.version = 11 : i64} {
  func.func @kernel(%arg0: i32, %arg1: i32, %arg2: memref<1x16x16xf32, #tpu.memory_space<vmem>>, %arg3: memref<1x16x16xf32, #tpu.memory_space<vmem>>, %arg4: memref<1x8x16xf32, #tpu.memory_space<vmem>>, %arg5: memref<16x8xf32, #tpu.memory_space<vmem>>, %arg6: memref<16x1xf32, #tpu.memory_space<vmem>>, %arg7: memref<1x16x16xf32, #tpu.memory_space<vmem>>) attributes {dimension_semantics = [#tpu.dimension_semantics<parallel>, #tpu.dimension_semantics<parallel>], iteration_bounds = array<i64: 2, 1>, scalar_prefetch = 0 : i64, scratch_operands = 0 : i64, tpu.core_type = #tpu.core_type<tc>, window_params = [{transform_indices = @transform_0, window_bounds = array<i64: 1, 16, 16>}, {transform_indices = @transform_1, window_bounds = array<i64: 1, 16, 16>}, {transform_indices = @transform_2, window_bounds = array<i64: 1, 8, 16>}, {pipeline_mode = #tpu.pipeline_mode<synchronous>, transform_indices = @transform_3, window_bounds = array<i64: 16, 8>}, {pipeline_mode = #tpu.pipeline_mode<synchronous>, transform_indices = @transform_4, window_bounds = array<i64: 16, 1>}, {transform_indices = @transform_5, window_bounds = array<i64: 1, 16, 16>}]} {
    %c0 = arith.constant 0 : index
    %c0_0 = arith.constant 0 : index
    %0 = vector.load %arg5[%c0, %c0_0] : memref<16x8xf32, #tpu.memory_space<vmem>>, vector<16x8xf32>
    %c0_1 = arith.constant 0 : index
    %c0_2 = arith.constant 0 : index
    %c0_3 = arith.constant 0 : index
    %1 = vector.load %arg4[%c0_1, %c0_2, %c0_3] : memref<1x8x16xf32, #tpu.memory_space<vmem>>, vector<1x8x16xf32>
    %2 = vector.shape_cast %1 : vector<1x8x16xf32> to vector<8x16xf32>
    %cst = arith.constant dense<0.000000e+00> : vector<16x16xf32>
    %3 = tpu.matmul %0, %2, %cst {dimension_numbers = #tpu.dot_dimension_numbers<[1], [0], [0], [1], [0, 0, 1, 1], [], []>, precision = #tpu.contract_precision<fp32>} : vector<16x8xf32>, vector<8x16xf32>, vector<16x16xf32> -> vector<16x16xf32>
    %c0_4 = arith.constant 0 : index
    %c0_5 = arith.constant 0 : index
    %4 = vector.load %arg6[%c0_4, %c0_5] : memref<16x1xf32, #tpu.memory_space<vmem>>, vector<16x1xf32>
    %5 = vector.broadcast %4 : vector<16x1xf32> to vector<16x16xf32>
    %6 = arith.addf %3, %5 : vector<16x16xf32>
    %c0_6 = arith.constant 0 : index
    %c0_7 = arith.constant 0 : index
    %c0_8 = arith.constant 0 : index
    %7 = vector.load %arg3[%c0_6, %c0_7, %c0_8] : memref<1x16x16xf32, #tpu.memory_space<vmem>>, vector<1x16x16xf32>
    %8 = vector.shape_cast %7 : vector<1x16x16xf32> to vector<16x16xf32>
    %c0_9 = arith.constant 0 : index
    %c0_10 = arith.constant 0 : index
    %c0_11 = arith.constant 0 : index
    %9 = vector.load %arg2[%c0_9, %c0_10, %c0_11] : memref<1x16x16xf32, #tpu.memory_space<vmem>>, vector<1x16x16xf32>
    %10 = vector.shape_cast %9 : vector<1x16x16xf32> to vector<16x16xf32>
    %cst_12 = arith.constant dense<0.000000e+00> : vector<16x16xf32>
    %11 = tpu.matmul %10, %8, %cst_12 {dimension_numbers = #tpu.dot_dimension_numbers<[1], [0], [0], [1], [0, 0, 1, 1], [], []>, precision = #tpu.contract_precision<fp32>} : vector<16x16xf32>, vector<16x16xf32>, vector<16x16xf32> -> vector<16x16xf32>
    %12 = arith.addf %11, %6 : vector<16x16xf32>
    %c0_13 = arith.constant 0 : index
    %c0_14 = arith.constant 0 : index
    %c0_15 = arith.constant 0 : index
    %13 = vector.load %arg7[%c0_13, %c0_14, %c0_15] : memref<1x16x16xf32, #tpu.memory_space<vmem>>, vector<1x16x16xf32>
    %14 = vector.shape_cast %13 : vector<1x16x16xf32> to vector<16x16xf32>
    %15 = vector.shape_cast %12 : vector<16x16xf32> to vector<1x16x16xf32>
    tpu.vector_store %arg7[%c0_13, %c0_14, %c0_15], %15 {strides = array<i32>} : memref<1x16x16xf32, #tpu.memory_space<vmem>>, vector<1x16x16xf32>,
    return
  }
  func.func @transform_0(%arg0: i32, %arg1: i32) -> (i32, i32, i32) {
    %c0_i32 = arith.constant 0 : i32
    %c0_i32_0 = arith.constant 0 : i32
    %c0_i32_1 = arith.constant 0 : i32
    return %arg0, %c0_i32, %c0_i32_0 : i32, i32, i32
  }
  func.func @transform_1(%arg0: i32, %arg1: i32) -> (i32, i32, i32) {
    %c0_i32 = arith.constant 0 : i32
    %c0_i32_0 = arith.constant 0 : i32
    return %arg0, %c0_i32, %arg1 : i32, i32, i32
  }
  func.func @transform_2(%arg0: i32, %arg1: i32) -> (i32, i32, i32) {
    %c0_i32 = arith.constant 0 : i32
    %c0_i32_0 = arith.constant 0 : i32
    return %arg0, %c0_i32, %arg1 : i32, i32, i32
  }
  func.func @transform_3(%arg0: i32, %arg1: i32) -> (i32, i32) {
    %c0_i32 = arith.constant 0 : i32
    %c0_i32_0 = arith.constant 0 : i32
    %c0_i32_1 = arith.constant 0 : i32
    return %c0_i32, %c0_i32_0 : i32, i32
  }
  func.func @transform_4(%arg0: i32, %arg1: i32) -> (i32, i32) {
    %c0_i32 = arith.constant 0 : i32
    %c0_i32_0 = arith.constant 0 : i32
    %c0_i32_1 = arith.constant 0 : i32
    return %c0_i32, %c0_i32_0 : i32, i32
  }
  func.func @transform_5(%arg0: i32, %arg1: i32) -> (i32, i32, i32) {
    %c0_i32 = arith.constant 0 : i32
    %c0_i32_0 = arith.constant 0 : i32
    return %arg0, %c0_i32, %arg1 : i32, i32, i32
  }
}

</mosaic_0001>

<bundles_post_ra>
// kernel: tpu_custom_call.1
= control target key start
LH: loop header
LB: loop body
LE: loop exit
PB: predicated region body
PF: predicated region fallthrough
CT: control target
= control target key end

     0   :  { %s2103_s0 = inlined_call_operand.vmem [shape: f32[2,16,16], index: 0, kind: input, shape index: {}]   ;;  %s2104_s1 = inlined_call_operand.hbm [shape: f32[2,16,16], index: 1, kind: input, shape index: {}]   ;;  %s2105_s2 = inlined_call_operand.hbm [shape: f32[2,8,16], index: 2, kind: input, shape index: {}]   ;;  %s2106_s3 = inlined_call_operand.vmem [shape: f32[16,8], index: 3, kind: input, shape index: {}]   ;;  %s2107_s4 = inlined_call_operand.vmem [shape: f32[16,1], index: 4, kind: input, shape index: {}]   ;;  %s2108_s5 = inlined_call_operand.hbm [shape: f32[2,16,16], index: 5, kind: output, shape index: {}]  }
   0x1   :  { %2110 = sst [smem:[#allocation13_spill]] %s2104_s1 }
   0x2   :  { %10 = vsyncpa [#allocation3], 0 }
   0x3   :  { %12 = vsyncpa [#allocation3 + $0x1], 0 }
   0x4   :  { %13 = vsyncpa [#allocation6], 0 }
   0x5   :  { %15 = vsyncpa [#allocation6 + $0x1], 0 }
   0x6   :  { %16 = vsyncpa [#allocation4], 0 }
   0x7   :  { %18 = vsyncpa [#allocation4 + $0x1], 0  ;;  %s1872_s18 = smov 0   ;;  %s1874_s19 = smov 0  }
   0x8   :  { %s1876_s20 = smov 0   ;;  %s1878_s21 = smov 0  }
   0x9   :  { %s1880_s22 = smov 0   ;;  %s1882_s23 = smov 0  }
   0xa LB: > { %s1482_s24 = sadd.s32 4294967295, %s1832_s23   ;;  %s1483_s25 = sadd.s32 4294967294, %s1832_s23   ;;  %s1832_s23 = sphi %s1882_s23, %s24_s23   ;;  %s1828_s22 = sphi %s1880_s22, %s2126_s22   ;;  %s1824_s21 = sphi %s1878_s21, %s2125_s21   ;;  %s1820_s20 = sphi %s1876_s20, %s2124_s20   ;;  %s1816_s19 = sphi %s1874_s19, %s2123_s19   ;;  %s1812_s18 = sphi %s1872_s18, %s2122_s18  }
   0xb   : > { %s36_s26 = sadd.s32 1, %s1828_s22  ;;  %s71_s27 = sadd.s32 1, %s1820_s20 }
   0xc   : > { %p38_p0 = scmp.ge.s32.totalorder %s36_s26, 2  ;;  %p78_p1 = scmp.ne.s32.totalorder %s1820_s20, %s1816_s19 }
   0xd   : > { %p79_p2 = scmp.eq.s32.totalorder %s1832_s23, 0  ;;  %p84_p3 = scmp.ne.s32.totalorder %s1816_s19, %s1812_s18 }
   0xe   : > { %s2128_s26 = smov (%p38_p0, %s36_s26), 0  ;;  %p85_p5 = scmp.eq.s32.totalorder %s1482_s24, 0 }
   0xf   : > { %2111 = sst [smem:[#allocation11_spill]] %s2128_s26  ;;  %p1913_p4 = por %p79_p2, %p78_p1 }
  0x10   : > { %s66_s29 = ssub.s32 %s1828_s22, %s2128_s26  ;;  %p180_p6 = scmp.eq.s32.totalorder %s1482_s24, 1 }
  0x11   : > { %p69_p7 = scmp.eq.s32.totalorder %s66_s29, 0  ;;  %p1919_p8 = por %p85_p5, %p84_p3 }
  0x12   : > { %p1923_p9 = por %p180_p6, %p78_p1  ;;  %p186_p10 = scmp.eq.s32.totalorder %s1483_s25, 1 }
  0x13   : > { %s1928_s7 = scalar_select %p69_p7, %s1820_s20, %s71_s27  }
  0x14   : > { %p1930_p11 = por %p186_p10, %p84_p3  ;;  %p1485_p12 = scmp.ge.s32.totalorder %s1832_s23, 2 }
  0x15   : > { %2115 = sst [smem:[#allocation12_spill]] %s1928_s7  ;;  %p1636_p13 = scmp.lt.s32.totalorder %s1832_s23, 2 }
  0x16   : > { %s1937_s9 = sand.u32 1, %s1820_s20   ;;  %s1502_s11 = sshll.u32 %s1828_s22, 8 }
  0x17   : > { %s1486_s10 = sshll.u32 %s1937_s9, 4  ;;  %s2117_s1 = sld [smem:[#allocation13_spill]] }
  0x18   : > { %s224_s15 = scalar_lea.vmem [#allocation2], %s1486_s10  ;;  %p1946_p0 = pnand %p1636_p13, %p1913_p4 }
  0x19   : > { %s232_s16 = sshll.u32 %s224_s15, 4  ;;  %p1491_p1 = scmp.ge.s32.totalorder %s1832_s23, 1  ;;  %s233_s16 = int_to_ptr.vmem [resolvable:$true] %s232_s16 }
  0x1a   : > { %s221_s24 = scalar_lea.sflag [#allocation3], %s1937_s9  ;;  %p1694_p2 = pneg %p1946_p0 }
  0x1b   : > { %s1705_s25 = scalar_lea.vmem %s233_s16, 256  ;;  %s1834_s27 = smov [#allocation2]  }
  0x1c   : > { %p1706_p3 = scmp.ne.s32.totalorder %s233_s16, %s1705_s25  ;;  %s1710_s29 = sshll.u32 %s1834_s27, 4  ;;  %s1711_s29 = int_to_ptr.vmem [resolvable:$false] %s1710_s29 }
  0x1d   : > { %s231_s14 = scalar_lea.hbm %s2117_s1, %s1502_s11  ;;  %s1712_s28 = scalar_lea.vmem %s1711_s29, 512 }
  0x1e   : > { %p1708_p5 = pnand %p1706_p3, %p1694_p2  ;;  %p1713_p4 = scmp.lt.s32.totalorder %s233_s16, %s1711_s29 }
  0x1f   : > { %p1714_p7 = scmp.lt.s32.totalorder %s1712_s28, %s1705_s25 }
  0x20   : > { %p1709_p6 = pneg %p1708_p5 }
  0x21   : > { %p1715_p10 = por %p1714_p7, %p1713_p4 }
  0x23   : > { %p1716_p13 = pnand %p1715_p10, %p1709_p6 }
  0x25   : > { %1719 = shalt.err (!%p1716_p13)
}
  0x26   : > { %s1835_s10 = smov 128   ;;  %s1836_s11 = smov 8  }
  0x27   : > { %1628 = dma.hbm_to_vmem [thread:$0]  (!%p1946_p0), %s231_s14, 256, %s233_s16, %s221_s24, %s1835_s10, %s1835_s10, %s1836_s11  }
  0x28   : > { %p259_p3 = scmp.lt.s32.totalorder %s1832_s23, 3  ;;  %s1489_s12 = sshll.u32 %s1937_s9, 3 }
  0x29   : > { %s1490_s13 = sshll.u32 %s1828_s22, 7  ;;  %s246_s28 = scalar_lea.vmem [#allocation5], %s1489_s12 }
  0x2a   : > { %p1964_p5 = pnand %p1491_p1, %p259_p3  ;;  %s252_s29 = scalar_lea.hbm %s2105_s2, %s1490_s13 }
  0x2b   : > { %s254_s1 = sshll.u32 %s246_s28, 4  ;;  %s243_s26 = scalar_lea.sflag [#allocation6], %s1937_s9  ;;  %s255_s1 = int_to_ptr.vmem [resolvable:$true] %s254_s1 }
  0x2c   : > { %s1733_s7 = scalar_lea.vmem %s255_s1, 128  ;;  %s1837_s14 = smov [#allocation5]  }
  0x2d   : > { %p1734_p6 = scmp.ne.s32.totalorder %s255_s1, %s1733_s7  ;;  %s1738_s16 = sshll.u32 %s1837_s14, 4  ;;  %s1739_s16 = int_to_ptr.vmem [resolvable:$false] %s1738_s16 }
  0x2e   : > { %s1740_s24 = scalar_lea.vmem %s1739_s16, 256  ;;  %p1741_p1 = scmp.lt.s32.totalorder %s255_s1, %s1739_s16 }
  0x2f   : > { %p1736_p4 = pnand %p1734_p6, %p1694_p2  ;;  %p1742_p10 = scmp.lt.s32.totalorder %s1740_s24, %s1733_s7 }
  0x31   : > { %p1737_p7 = pneg %p1736_p4  ;;  %p1743_p13 = por %p1742_p10, %p1741_p1 }
  0x33   : > { %p1744_p3 = pnand %p1743_p13, %p1737_p7 }
  0x35   : > { %1747 = shalt.err (!%p1744_p3)
}
  0x36   : > { %1631 = dma.hbm_to_vmem [thread:$0]  (!%p1946_p0), %s252_s29, 128, %s255_s1, %s243_s26  }
  0x37   : > { %263 = sbr.rel (%p1964_p5) target bundleno = 316 (0x13c), region = 40  ;;  %s1980_s9 = sand.u32 (!%p1964_p5), 1, %s1816_s19  }
  0x38   : > { %s1492_s10 = sshll.u32 (!%p1964_p5), %s1980_s9, 4  ;;  %s266_s11 = scalar_lea.sflag (!%p1964_p5), [#allocation3], %s1980_s9 }
  0x39   : > { %s269_s7 = scalar_lea.vmem (!%p1964_p5), [#allocation2], %s1492_s10 }
  0x3c   : > { %1799 = dma.done.wait (%p1919_p8), %s266_s11, 256  }
  0x3d   : > { %1801 = vsyncadd (%p1919_p8), %s266_s11, 4294967040  ;;  %s1493_s1 = sshll.u32 %s1980_s9, 3  ;;  %s275_s26 = scalar_lea.sflag [#allocation6], %s1980_s9 }
  0x3e   : > { %s278_s17 = scalar_lea.vmem [#allocation5], %s1493_s1 }
  0x3f   : > { %1803 = dma.done.wait (%p1919_p8), %s275_s26, 128  }
  0x40   : > { %1805 = vsyncadd (%p1919_p8), %s275_s26, 4294967168  ;;  %p315_p0 = scmp.lt.s32.totalorder %s1824_s21, 1  ;;  %v1838_v0 = vmov 0   ;;  %vm335_vm0 = vcmask 64512   ;;  %v322_v1 = vld [vmem:[%s278_s17] sm:$0xff]  ;;  %vm835_vm1 = vcmask 130048  }
  0x41   : > { %1691 = vset.pattern.permute.xlu0 %v1838_v0  ;;  %v320_v2 = vld [vmem:[%s2106_s3] sm:$0xff]  ;;  %v321_v3 = vld [vmem:[%s2106_s3 + $0x8] sm:$0xff]  ;;  %v373_v4 = vand.u32 4294901760, %v322_v1  ;;  %s314_s1 = scalar_lea.vmem [#allocation7], %s1492_s10  ;;  %s1504_s17 = sshll.u32 %s1824_s21, 8 }
  0x42   : > { %s316_s12 = scalar_select %p315_p0, %s1824_s21, 1  ;;  %v337_v5 = vsel %vm335_vm0, %v320_v2, 0  ;;  %v340_v6 = vsel %vm335_vm0, %v321_v3, 0  ;;  %v832_v7 = vld [vmem:[%s269_s7 + $0x8] sm:$0xff]  ;;  %v831_v8 = vld [vmem:[%s269_s7] sm:$0xff] }
  0x43   : > { %v408_v10 = vand.u32 4294901760, %v337_v5  ;;  %v418_v11 = vand.u32 4294901760, %v340_v6  ;;  %v2007_v12 = vand.u32 4294901760, %v832_v7  ;;  %v323_v14 = vld [vmem:[%s2107_s4] sm:$0xff]  ;;  %1547 = vmatprep.subr.mxu0 %v373_v4  ;;  %v460_v15 = vsub.f32 %v322_v1, %v373_v4  ;;  %v324_v21 = vld [vmem:[%s2107_s4 + $0x8] sm:$0xff]  ;;  %s1361_s26 = sshll.u32 %s314_s1, 4  ;;  %s2053_s15 = scalar_lea.hbm %s2108_s5, %s1504_s17  ;;  %s2048_s26 = int_to_ptr.vmem [resolvable:$true] %s1361_s26 }
  0x44   : > { %s1503_s13 = sshll.u32 %s316_s12, 4  ;;  %327 = vperm.xlu0 %1691, %v323_v14   ;;  %1548 = vmatpush3.msra.mxu0 %v373_v4  ;;  %v2013_v19 = vand.u32 4294901760, %v831_v8  ;;  %s1347_s21 = scalar_lea.sflag [#allocation4], %s1980_s9 }
  0x45   : > { %s319_s27 = scalar_lea.vmem %s2103_s0, %s1503_s13  ;;  %v409_v17 = vsub.f32 %v337_v5, %v408_v10  ;;  %1554 = vmatprep.mubr.f32.mxu1 %v408_v10  ;;  %v419_v18 = vsub.f32 %v340_v6, %v418_v11  ;;  %v461_v22 = vand.u32 4294901760, %v460_v15  ;;  %1557 = vmatprep.subr.mxu0 %v460_v15  ;;  %v959_v26 = vsub.f32 %v832_v7, %v2007_v12  ;;  %s1748_s10 = scalar_lea.vmem %s2048_s26, 256 }
  0x46   : > { %v833_v9 = vld [vmem:[%s319_s27] sm:$0xff]  ;;  %v834_v13 = vld [vmem:[%s319_s27 + $0x8] sm:$0xff]  ;;  %v966_v31 = vsub.f32 %v831_v8, %v2013_v19  ;;  %p1749_p8 = scmp.ne.s32.totalorder %s2048_s26, %s1748_s10  ;;  %s1839_s25 = smov [#allocation7]  }
  0x47   : > { %v837_v16 = vsel %vm835_vm1, %v833_v9, 0  ;;  %v840_v20 = vsel %vm835_vm1, %v834_v13, 0  ;;  %v410_v24 = vand.u32 4294901760, %v409_v17  ;;  %v420_v25 = vand.u32 4294901760, %v419_v18  ;;  %s1752_s27 = sshll.u32 %s1839_s25, 4  ;;  %s1753_s27 = int_to_ptr.vmem [resolvable:$false] %s1752_s27 }
  0x48   : > { %v2019_v23 = vand.u32 4294901760, %v837_v16  ;;  %v462_v27 = vsub.f32 %v460_v15, %v461_v22  ;;  %v2022_v28 = vand.u32 4294901760, %v840_v20  ;;  %332 = vperm.xlu0 %1691, %v324_v21   ;;  %v960_v36 = vand.u32 4294901760, %v959_v26  ;;  %p1750_p2 = pnand %p1749_p8, %p1923_p9  ;;  %s1754_s29 = scalar_lea.vmem %s1753_s27, 512 }
  0x49   : > { %v411_v29 = vsub.f32 %v409_v17, %v410_v24  ;;  %v421_v30 = vsub.f32 %v419_v18, %v420_v25  ;;  %v967_v38 = vand.u32 4294901760, %v966_v31  ;;  %p1755_p6 = scmp.lt.s32.totalorder %s2048_s26, %s1753_s27  ;;  %p1756_p4 = scmp.lt.s32.totalorder %s1754_s29, %s1748_s10 }
  0x4a   : > { %v463_v32 = vand.u32 4294901760, %v462_v27  ;;  %v910_v33 = vsub.f32 %v837_v16, %v2019_v23  ;;  %v920_v37 = vsub.f32 %v840_v20, %v2022_v28  ;;  %v961_v40 = vsub.f32 %v959_v26, %v960_v36  ;;  %p1751_p5 = pneg %p1750_p2 }
  0x4b   : > { %v412_v34 = vand.u32 4294901760, %v411_v29  ;;  %v422_v35 = vand.u32 4294901760, %v421_v30  ;;  %v968_v42 = vsub.f32 %v966_v31, %v967_v38  ;;  %p1757_p7 = por %p1756_p4, %p1755_p6 }
  0x4c   : > { %1552 = vmatprep.subr.mxu1 %v463_v32  ;;  %v911_v39 = vand.u32 4294901760, %v910_v33  ;;  %v921_v41 = vand.u32 4294901760, %v920_v37  ;;  %v962_v44 = vand.u32 4294901760, %v961_v40 }
  0x4d   : > { %1549 = vmatprep.mubr.f32.mxu0 %v412_v34  ;;  %1553 = vmatpush3.msra.mxu1 %v463_v32  ;;  %v969_v46 = vand.u32 4294901760, %v968_v42  ;;  %p1758_p1 = pnand %p1757_p7, %p1751_p5 }
  0x4e   : > { %1550 = vmatmul.mubr.f32.vlgmr.msra.gmra.mxu0 %v422_v35  ;;  %1555 = vmatmul.mubr.f32.vlgmr.msra.gmra.mxu1 %v418_v11  ;;  %v912_v43 = vsub.f32 %v910_v33, %v911_v39  ;;  %v922_v45 = vsub.f32 %v920_v37, %v921_v41 }
  0x4f   : > { %1558 = vmatpush3.msra.mxu0 %v460_v15  ;;  %1562 = vmatprep.subr.mxu1 %v373_v4 }
  0x50   : > { %1563 = vmatpush3.msra.mxu1 %v373_v4  ;;  %1559 = vmatprep.mubr.f32.mxu0 %v409_v17  ;;  %v913_v47 = vand.u32 4294901760, %v912_v43  ;;  %v923_v48 = vand.u32 4294901760, %v922_v45 }
  0x51   : > { %1564 = vmatprep.mubr.f32.mxu1 %v410_v24  ;;  %1567 = vmatprep.subr.mxu0 %v461_v22 }
  0x52   : > { %1560 = vmatmul.mubr.f32.vlgmr.msra.gmra.mxu0 %v419_v18  ;;  %1565 = vmatmul.mubr.f32.vlgmr.msra.gmra.mxu1 %v420_v25 }
  0x53   : > { %1568 = vmatpush3.msra.mxu0 %v461_v22  ;;  %1572 = vmatprep.subr.mxu1 %v373_v4 }
  0x54   : > { %1573 = vmatpush3.msra.mxu1 %v373_v4  ;;  %1569 = vmatprep.mubr.f32.mxu0 %v408_v10 }
  0x55   : > { %1574 = vmatprep.mubr.f32.mxu1 %v408_v10  ;;  %1577 = vmatprep.subr.mxu0 %v2007_v12 }
  0x56   : > { %1570 = vmatmul.mubr.f32.vlgmr.msra.gmra.mxu0 %v418_v11  ;;  %1575 = vmatmul.mubr.f32.vlgmr.msra.gmra.mxu1 %v418_v11 }
  0x57   : > { %1578 = vmatpush3.msra.mxu0 %v2007_v12  ;;  %1584 = vmatprep.subr.mxu1 %v962_v44 }
  0x58   : > { %1579 = vmatprep.subr.mxu0 %v2013_v19  ;;  %1585 = vmatpush3.msra.mxu1 %v962_v44 }
  0x59   : > { %1580 = vmatpush3.msra.mxu0 %v2013_v19  ;;  %1586 = vmatprep.subr.mxu1 %v969_v46 }
  0x5a   : > { %1581 = vmatprep.mubr.f32.mxu0 %v913_v47  ;;  %1587 = vmatpush3.msra.mxu1 %v969_v46 }
  0x5b   : > { %1588 = vmatprep.mubr.f32.mxu1 %v2019_v23  ;;  %1591 = vmatprep.subr.mxu0 %v959_v26 }
  0x5c   : > { %1582 = vmatmul.mubr.f32.vlgmr.msra.gmra.mxu0 %v923_v48  ;;  %1589 = vmatmul.mubr.f32.vlgmr.msra.gmra.mxu1 %v2022_v28 }
  0x5d   : > { %1592 = vmatpush3.msra.mxu0 %v959_v26  ;;  %1598 = vmatprep.subr.mxu1 %v2007_v12 }
  0x5e   : > { %1593 = vmatprep.subr.mxu0 %v966_v31  ;;  %1599 = vmatpush3.msra.mxu1 %v2007_v12 }
  0x5f   : > { %1594 = vmatpush3.msra.mxu0 %v966_v31  ;;  %1600 = vmatprep.subr.mxu1 %v2013_v19 }
  0x60   : > { %1595 = vmatprep.mubr.f32.mxu0 %v910_v33  ;;  %1601 = vmatpush3.msra.mxu1 %v2013_v19 }
  0x61   : > { %1602 = vmatprep.mubr.f32.mxu1 %v911_v39  ;;  %1605 = vmatprep.subr.mxu0 %v960_v36 }
  0x62   : > { %1596 = vmatmul.mubr.f32.vlgmr.msra.gmra.mxu0 %v920_v37  ;;  %1603 = vmatmul.mubr.f32.vlgmr.msra.gmra.mxu1 %v921_v41 }
  0x63   : > { %1606 = vmatpush3.msra.mxu0 %v960_v36  ;;  %1612 = vmatprep.subr.mxu1 %v2007_v12 }
  0x64   : > { %1607 = vmatprep.subr.mxu0 %v967_v38  ;;  %1613 = vmatpush3.msra.mxu1 %v2007_v12 }
  0x65   : > { %1608 = vmatpush3.msra.mxu0 %v967_v38  ;;  %1614 = vmatprep.subr.mxu1 %v2013_v19 }
  0x66   : > { %1609 = vmatprep.mubr.f32.mxu0 %v2019_v23  ;;  %1615 = vmatpush3.msra.mxu1 %v2013_v19 }
  0x67   : > { %1616 = vmatprep.mubr.f32.mxu1 %v2019_v23  ;;  %1610 = vmatmul.mubr.f32.vlgmr.msra.gmra.mxu0 %v2022_v28 }
  0x68   : > { %1617 = vmatmul.mubr.f32.vlgmr.msra.gmra.mxu1 %v2022_v28 }
  0xbf   : > { %v328_v49 = vpop.permute.xlu0 %327 }
  0xc3   : > { %v333_v50 = vpop.permute.xlu0 %332 }
 0x10e   : > { %v1551_v51 = vpop.f32.mrf.mxu0  ;;  %v1556_v52 = vpop.f32.mrf.mxu1 }
 0x10f   : > { %v425_v53 = vadd.f32 %v1551_v51, %v333_v50 }
 0x110   : > { %v414_v54 = vpop.f32.mrf.mxu0  ;;  %v500_v55 = vpop.f32.mrf.mxu1 }
 0x111   : > { %v507_v56 = vadd.f32 %v1556_v52, %v425_v53  ;;  %v415_v57 = vadd.f32 %v414_v54, %v328_v49 }
 0x112   : > { %v1561_v58 = vpop.f32.mrf.mxu0  ;;  %v1566_v59 = vpop.f32.mrf.mxu1 }
 0x113   : > { %v501_v60 = vadd.f32 %v500_v55, %v415_v57  ;;  %v588_v61 = vadd.f32 %v1561_v58, %v507_v56 }
 0x114   : > { %v580_v62 = vpop.f32.mrf.mxu0  ;;  %v661_v63 = vpop.f32.mrf.mxu1 }
 0x115   : > { %v670_v0 = vadd.f32 %v1566_v59, %v588_v61  ;;  %v581_v1 = vadd.f32 %v580_v62, %v501_v60 }
 0x116   : > { %v1571_v2 = vpop.f32.mrf.mxu0  ;;  %v1576_v3 = vpop.f32.mrf.mxu1 }
 0x117   : > { %v662_v4 = vadd.f32 %v661_v63, %v581_v1  ;;  %v750_v5 = vadd.f32 %v1571_v2, %v670_v0 }
 0x118   : > { %v743_v6 = vpop.f32.mrf.mxu0  ;;  %v821_v7 = vpop.f32.mrf.mxu1 }
 0x119   : > { %v828_v8 = vadd.f32 %v1576_v3, %v750_v5  ;;  %v744_v9 = vadd.f32 %v743_v6, %v662_v4 }
 0x11b   : > { %v822_v10 = vadd.f32 %v821_v7, %v744_v9 }
 0x11c   : > { %v1583_v11 = vpop.f32.mrf.mxu0  ;;  %v1590_v12 = vpop.f32.mrf.mxu1 }
 0x11d   : > { %v926_v13 = vadd.f32 %v1583_v11, %v828_v8 }
 0x11e   : > { %v915_v14 = vpop.f32.mrf.mxu0  ;;  %v1006_v15 = vpop.f32.mrf.mxu1 }
 0x11f   : > { %v1013_v16 = vadd.f32 %v1590_v12, %v926_v13  ;;  %v916_v17 = vadd.f32 %v915_v14, %v822_v10 }
 0x121   : > { %v1007_v18 = vadd.f32 %v1006_v15, %v916_v17 }
 0x122   : > { %v1597_v19 = vpop.f32.mrf.mxu0  ;;  %v1604_v20 = vpop.f32.mrf.mxu1 }
 0x123   : > { %v1096_v21 = vadd.f32 %v1597_v19, %v1013_v16 }
 0x124   : > { %v1088_v22 = vpop.f32.mrf.mxu0  ;;  %v1170_v23 = vpop.f32.mrf.mxu1 }
 0x125   : > { %v1179_v24 = vadd.f32 %v1604_v20, %v1096_v21  ;;  %v1089_v25 = vadd.f32 %v1088_v22, %v1007_v18 }
 0x127   : > { %v1171_v26 = vadd.f32 %v1170_v23, %v1089_v25  ;;  %v1611_v27 = vpop.f32.mrf.mxu0 }
 0x128   : > { %v1262_v28 = vadd.f32 %v1611_v27, %v1179_v24  ;;  %v1618_v29 = vpop.f32.mrf.mxu1 }
 0x129   : > { %v1255_v30 = vpop.f32.mrf.mxu0 }
 0x12a   : > { %v1341_v31 = vadd.f32 %v1618_v29, %v1262_v28  ;;  %v1256_v32 = vadd.f32 %v1255_v30, %v1171_v26  ;;  %v1334_v33 = vpop.f32.mrf.mxu1 }
 0x12c   : > { %1345 = vst.msk [vmem:[%s314_s1 + $0x8] sm:$0xff] %vm835_vm1, %v1341_v31  ;;  %v1335_v34 = vadd.f32 %v1334_v33, %v1256_v32 }
 0x12e   : > { %1344 = vst.msk [vmem:[%s314_s1] sm:$0xff] %vm835_vm1, %v1335_v34 }
 0x12f   : > { %1761 = shalt.err (!%p1758_p1)
}
 0x130   : > { %s1762_s28 = scalar_lea.hbm %s2053_s15, 256  ;;  %s1766_s16 = scalar_lea.hbm %s2108_s5, 512 }
 0x131   : > { %p1763_p10 = scmp.ne.s32.totalorder %s2053_s15, %s1762_s28  ;;  %p1767_p0 = scmp.lt.s32.totalorder %s2053_s15, %s2108_s5 }
 0x132   : > { %p1768_p8 = scmp.lt.s32.totalorder %s1766_s16, %s1762_s28 }
 0x133   : > { %p1764_p13 = pnand %p1763_p10, %p1923_p9 }
 0x134   : > { %p1769_p2 = por %p1768_p8, %p1767_p0 }
 0x135   : > { %p1765_p3 = pneg %p1764_p13 }
 0x137   : > { %p1770_p5 = pnand %p1769_p2, %p1765_p3 }
 0x139   : > { %1773 = shalt.err (!%p1770_p5)
}
 0x13a   : > { %s1840_s7 = smov 128   ;;  %s1841_s1 = smov 8  }
 0x13b   : > { %1623 = dma.vmem_to_hbm [thread:$0]  (%p1923_p9), %s2048_s26, 256, %s2053_s15, %s1347_s21, %s1840_s7, %s1840_s7, %s1841_s1  }
 0x13c PF: > { %s1376_s17 = sand.u32 1, %s1812_s18   ;;  %p1633_p6 = pnand %p1485_p12, %p1930_p11 }
 0x13d   : > { %s1377_s12 = scalar_lea.sflag [#allocation4], %s1376_s17 }
 0x13e   : > { %p1634_p4 = pneg %p1633_p6 }
 0x140   : > { %1807 = dma.done.wait (%p1634_p4), %s1377_s12, 256  }
 0x141   : > { %1809 = vsyncadd (%p1634_p4), %s1377_s12, 4294967040  ;;  %s24_s23 = sadd.s32 1, %s1832_s23   ;;  %s2120_s6 = sld [smem:[#allocation12_spill]] }
 0x142   : > { %p21_p7 = scmp.ge.s32.totalorder %s24_s23, 4   ;;  %s2121_s9 = sld [smem:[#allocation11_spill]] }
 0x143   : > { %s2122_s18 = smov %s1816_s19  ;;  %s2123_s19 = smov %s1820_s20 }
 0x144   : > { %s2125_s21 = smov %s1828_s22  ;;  %23 = sbr.rel (!%p21_p7) target bundleno = 10 (0xa), region = 101 }
 0x147   : > { %s2124_s20 = smov %s2120_s6 }
 0x148   : > { %s2126_s22 = smov %s2121_s9 }
 0x149   :  { %1382 = vsyncpa [#allocation3], 1 }
 0x14a   :  { %1384 = vsyncpa [#allocation3 + $0x1], 1 }
 0x14b   :  { %1385 = vsyncpa [#allocation6], 1 }
 0x14c   :  { %1387 = vsyncpa [#allocation6 + $0x1], 1 }
 0x14d   :  { %1388 = vsyncpa [#allocation4], 1 }
 0x14e   :  { %1390 = vsyncpa [#allocation4 + $0x1], 1 }

</bundles_post_ra>
